<compile_context>
chip_gen: v5e
topology: v5e:2x2
jax: 0.10.0
libtpu: 0.0.40
codegen_flags: <defaults>
</compile_context>

<pallas_src>
import functools
import math

import jax
import jax.numpy as jnp
from jax.experimental import pallas as pl
from jax.experimental.pallas import tpu as pltpu

_NEG_BIG = -1e30  # fill for non-softmax lanes before exp -> underflows to 0


def _round_up(x, m):
    return ((x + m - 1) // m) * m


def _mixture_head_kernel(x_ref, w_ref, b_ref, out_ref, *, min_var, n):
    """Fused head: one [tb, D] x [D, npack] matmul; the three heads occupy
    contiguous N-wide lane ranges [0,N) / [N,2N) / [2N,3N) of the packed
    output block.  All three transforms are computed over the full lane width
    (VPU/EUP have plenty of slack in this write-bound kernel) and a lane-iota
    select picks which transform lands in each lane -> a single unmasked,
    lane-dense store."""
    x = x_ref[...]                                                  # (tb, D)
    h = (jnp.dot(x, w_ref[...], preferred_element_type=jnp.float32)
         + b_ref[...])                                              # (tb, npack)

    lane = jax.lax.broadcasted_iota(jnp.int32, h.shape, dimension=1)

    # sigs = sqrt(min_var * softplus(h) + min_var)   (numerically stable)
    softplus = jnp.maximum(h, 0.0) + jnp.log(1.0 + jnp.exp(-jnp.abs(h)))
    sigs = jnp.sqrt(min_var * softplus + min_var)

    # ws = exp(log_softmax(linear3(x))) == softmax restricted to lanes [2N,3N).
    sm_mask = (lane >= 2 * n) & (lane < 3 * n)
    h_sm = jnp.where(sm_mask, h, _NEG_BIG)
    m = jnp.max(h_sm, axis=-1, keepdims=True)        # max over real ws lanes
    e = jnp.exp(h_sm - m)                             # masked lanes -> 0
    denom = jnp.sum(e, axis=-1, keepdims=True)
    ws = e * (1.0 / denom)       # EXACT reciprocal of a [tb,1] column (free)

    out = jnp.where(lane < n, h, jnp.where(lane < 2 * n, sigs, ws))
    out_ref[...] = out.astype(out_ref.dtype)


def mixture_gaussian_head_packed(x, w1, b1, w2, b2, w3, b3, *, min_var,
                                 tb=None):
    """Returns (packed, N): packed is [B, npack] f32 with lanes
    [0,N)=mus, [N,2N)=sigs, [2N,3N)=ws, remaining lanes are padding."""
    B, D = x.shape
    N = w1.shape[1]
    npack = _round_up(3 * N, 128)
    pad = npack - 3 * N

    # ---- pack weights/biases into one lane-padded [D, npack] matmul ----
    w_packed = jnp.concatenate([w1, w2, w3], axis=1)
    b_packed = jnp.concatenate([b1, b2, b3], axis=1)
    if pad:
        w_packed = jnp.pad(w_packed, ((0, 0), (0, pad)))
        b_packed = jnp.pad(b_packed, ((0, 0), (0, pad)))

    # ---- batch tile: one full-height block for small B (no padding, legal
    # for any B via the full-dim rule), else large 8-aligned tiles with a
    # partial last block handled by Pallas (OOB writes dropped). ----
    if tb is None:
        tb = B if B <= 2048 else 2048
    tb = int(tb)
    if tb >= B:
        tb = B
    else:
        tb = max(8, _round_up(tb, 8))
    grid = (pl.cdiv(B, tb),)

    # explicit VMEM budget (double-buffered blocks) with headroom below the
    # 64 MiB physical VMEM of v7x; safe across v5e/v6e/v7x.
    per_step = 4 * (tb * D + D * npack + npack + tb * npack)
    vmem_limit = int(min(48 << 20, max(2 * per_step + (1 << 20), 16 << 20)))

    kernel = functools.partial(_mixture_head_kernel,
                               min_var=float(min_var), n=N)

    packed = pl.pallas_call(
        kernel,
        out_shape=jax.ShapeDtypeStruct((B, npack), jnp.float32),
        grid_spec=pltpu.PrefetchScalarGridSpec(
            num_scalar_prefetch=0,
            grid=grid,
            in_specs=[pl.BlockSpec((tb, D), lambda i: (i, 0)),
                      pl.BlockSpec((D, npack), lambda i: (0, 0)),
                      pl.BlockSpec((1, npack), lambda i: (0, 0))],
            out_specs=pl.BlockSpec((tb, npack), lambda i: (i, 0)),
        ),
        compiler_params=pltpu.CompilerParams(
            dimension_semantics=("parallel",),
            vmem_limit_bytes=vmem_limit),
    )(x, w_packed, b_packed)
    return packed, N


def mixture_gaussian_head(x, w1, b1, w2, b2, w3, b3, *, min_var, tb=None):
    """x: [B, D]; w*: [D, N]; b*: [1, N]. Returns (mus, sigs, ws), each [B, N].

    Note: the module's default min_var=0 makes sigs identically zero
    (degenerate); callers normally pass min_var > 0.  Consumers that accept a
    packed layout can call mixture_gaussian_head_packed() and avoid the three
    thin slice copies below.
    """
    packed, N = mixture_gaussian_head_packed(x, w1, b1, w2, b2, w3, b3,
                                             min_var=min_var, tb=tb)
    mus = packed[:, 0:N]
    sigs = packed[:, N:2 * N]
    ws = packed[:, 2 * N:3 * N]
    return mus, sigs, ws


def _init_linear(key, fan_in, fan_out):
    """Deterministic init mimicking nn.Linear (uniform(-1/sqrt(fan_in), +))."""
    kw, kb = jax.random.split(key)
    bound = 1.0 / math.sqrt(fan_in)
    # stored transposed: [fan_in, fan_out]
    w = jax.random.uniform(kw, (fan_in, fan_out), jnp.float32, -bound, bound)
    b = jax.random.uniform(kb, (1, fan_out), jnp.float32, -bound, bound)
    return w, b


def _reference(x, w1, b1, w2, b2, w3, b3, min_var):
    mus = x @ w1 + b1
    sigs = jnp.sqrt(min_var * jax.nn.softplus(x @ w2 + b2) + min_var)
    ws = jax.nn.softmax(x @ w3 + b3, axis=-1)
    return mus, sigs, ws


def _check(B, D, N, min_var, seed, tb=None):
    root = jax.random.PRNGKey(seed)
    kx, k1, k2, k3 = jax.random.split(root, 4)
    x = jax.random.normal(kx, (B, D), jnp.float32)
    w1, b1 = _init_linear(k1, D, N)
    w2, b2 = _init_linear(k2, D, N)
    w3, b3 = _init_linear(k3, D, N)

    mus, sigs, ws = mixture_gaussian_head(x, w1, b1, w2, b2, w3, b3,
                                          min_var=min_var, tb=tb)
    jax.block_until_ready((mus, sigs, ws))

    r_mus, r_sigs, r_ws = _reference(x, w1, b1, w2, b2, w3, b3, min_var)
    assert mus.shape == (B, N) and sigs.shape == (B, N) and ws.shape == (B, N)
    assert jnp.allclose(mus, r_mus, atol=1e-5, rtol=1e-5)
    assert jnp.allclose(sigs, r_sigs, atol=1e-5, rtol=1e-5)
    assert jnp.allclose(ws, r_ws, atol=1e-4, rtol=1e-4)
    # mixture weights must sum to 1 (exact reciprocal now, so tight tolerance)
    assert jnp.allclose(jnp.sum(ws, axis=-1), 1.0, atol=1e-4)


if __name__ == "__main__":
    # Shapes consistent with the module: input_size=32, out_size=4, n_mix=5
    # -> N = 20. min_var defaults to 0 in the module (degenerate sigs=0);
    # use 0.1 here for a nontrivial path.
    D = 32
    out_size, n_mix = 4, 5
    N = out_size * n_mix
    min_var = 0.1

    _check(B=16, D=D, N=N, min_var=min_var, seed=0)          # single full block
    _check(B=13, D=D, N=N, min_var=min_var, seed=1)          # ragged B, full-dim block
    _check(B=64, D=D, N=N, min_var=min_var, seed=2, tb=16)   # grid=4, weight revisit
    _check(B=21, D=D, N=N, min_var=min_var, seed=3, tb=8)    # partial last block

    print("KERNEL_OK")
</pallas_src>

<mosaic_0001>
module attributes {stable_mosaic.version = 11 : i64} {
  func.func @_mixture_head_kernel(%arg0: i32, %arg1: memref<16x32xf32, #tpu.memory_space<vmem>>, %arg2: memref<32x128xf32, #tpu.memory_space<vmem>>, %arg3: memref<1x128xf32, #tpu.memory_space<vmem>>, %arg4: memref<16x128xf32, #tpu.memory_space<vmem>>) attributes {dimension_semantics = [#tpu.dimension_semantics<parallel>], iteration_bounds = array<i64: 1>, scalar_prefetch = 0 : i64, scratch_operands = 0 : i64, tpu.core_type = #tpu.core_type<tc>, window_params = [{transform_indices = @transform_0, window_bounds = array<i64: 16, 32>}, {pipeline_mode = #tpu.pipeline_mode<synchronous>, transform_indices = @transform_1, window_bounds = array<i64: 32, 128>}, {pipeline_mode = #tpu.pipeline_mode<synchronous>, transform_indices = @transform_2, window_bounds = array<i64: 1, 128>}, {transform_indices = @transform_3, window_bounds = array<i64: 16, 128>}]} {
    %c0 = arith.constant 0 : index
    %c0_0 = arith.constant 0 : index
    %0 = vector.load %arg1[%c0, %c0_0] : memref<16x32xf32, #tpu.memory_space<vmem>>, vector<16x32xf32>
    %c0_1 = arith.constant 0 : index
    %c0_2 = arith.constant 0 : index
    %1 = vector.load %arg2[%c0_1, %c0_2] : memref<32x128xf32, #tpu.memory_space<vmem>>, vector<32x128xf32>
    %cst = arith.constant dense<0.000000e+00> : vector<16x128xf32>
    %2 = tpu.matmul %0, %1, %cst {dimension_numbers = #tpu.dot_dimension_numbers<[1], [0], [0], [1], [0, 0, 1, 1], [], []>} : vector<16x32xf32>, vector<32x128xf32>, vector<16x128xf32> -> vector<16x128xf32>
    %c0_3 = arith.constant 0 : index
    %c0_4 = arith.constant 0 : index
    %3 = vector.load %arg3[%c0_3, %c0_4] : memref<1x128xf32, #tpu.memory_space<vmem>>, vector<1x128xf32>
    %4 = vector.broadcast %3 : vector<1x128xf32> to vector<16x128xf32>
    %5 = arith.addf %2, %4 : vector<16x128xf32>
    %6 = tpu.iota {dimensions = array<i32: 1>} : vector<16x128xi32>
    %cst_5 = arith.constant 0.000000e+00 : f32
    %7 = vector.broadcast %cst_5 : f32 to vector<16x128xf32>
    %8 = arith.maximumf %5, %7 : vector<16x128xf32>
    %9 = math.absf %5 : vector<16x128xf32>
    %cst_6 = arith.constant 0.000000e+00 : f32
    %10 = vector.broadcast %cst_6 : f32 to vector<16x128xf32>
    %11 = arith.subf %10, %9 : vector<16x128xf32>
    %12 = math.exp %11 : vector<16x128xf32>
    %cst_7 = arith.constant 1.000000e+00 : f32
    %13 = vector.broadcast %cst_7 : f32 to vector<16x128xf32>
    %14 = arith.addf %13, %12 : vector<16x128xf32>
    %15 = math.log %14 : vector<16x128xf32>
    %16 = arith.addf %8, %15 : vector<16x128xf32>
    %cst_8 = arith.constant 1.000000e-01 : f32
    %17 = vector.broadcast %cst_8 : f32 to vector<16x128xf32>
    %18 = arith.mulf %17, %16 : vector<16x128xf32>
    %cst_9 = arith.constant 1.000000e-01 : f32
    %19 = vector.broadcast %cst_9 : f32 to vector<16x128xf32>
    %20 = arith.addf %18, %19 : vector<16x128xf32>
    %21 = math.sqrt %20 : vector<16x128xf32>
    %c40_i32 = arith.constant 40 : i32
    %22 = vector.broadcast %c40_i32 : i32 to vector<16x128xi32>
    %23 = arith.cmpi sge, %6, %22 : vector<16x128xi32>
    %c60_i32 = arith.constant 60 : i32
    %24 = vector.broadcast %c60_i32 : i32 to vector<16x128xi32>
    %25 = arith.cmpi slt, %6, %24 : vector<16x128xi32>
    %26 = arith.andi %23, %25 : vector<16x128xi1>
    %cst_10 = arith.constant -1.000000e+30 : f32
    %27 = vector.broadcast %cst_10 : f32 to vector<16x128xf32>
    %28 = arith.select %26, %5, %27 : vector<16x128xi1>, vector<16x128xf32>
    %cst_11 = arith.constant dense<0xFF800000> : vector<16xf32>
    %29 = vector.multi_reduction <maximumf>, %28, %cst_11 [1] : vector<16x128xf32> to vector<16xf32>
    %30 = vector.shape_cast %29 : vector<16xf32> to vector<16x1xf32>
    %31 = vector.broadcast %30 : vector<16x1xf32> to vector<16x128xf32>
    %32 = arith.subf %28, %31 : vector<16x128xf32>
    %33 = math.exp %32 : vector<16x128xf32>
    %cst_12 = arith.constant dense<0.000000e+00> : vector<16xf32>
    %34 = vector.multi_reduction <add>, %33, %cst_12 [1] : vector<16x128xf32> to vector<16xf32>
    %35 = vector.shape_cast %34 : vector<16xf32> to vector<16x1xf32>
    %cst_13 = arith.constant 1.000000e+00 : f32
    %36 = vector.broadcast %cst_13 : f32 to vector<16x1xf32>
    %37 = arith.divf %36, %35 : vector<16x1xf32>
    %38 = vector.broadcast %37 : vector<16x1xf32> to vector<16x128xf32>
    %39 = arith.mulf %33, %38 : vector<16x128xf32>
    %c20_i32 = arith.constant 20 : i32
    %40 = vector.broadcast %c20_i32 : i32 to vector<16x128xi32>
    %41 = arith.cmpi slt, %6, %40 : vector<16x128xi32>
    %c40_i32_14 = arith.constant 40 : i32
    %42 = vector.broadcast %c40_i32_14 : i32 to vector<16x128xi32>
    %43 = arith.cmpi slt, %6, %42 : vector<16x128xi32>
    %44 = arith.select %43, %21, %39 : vector<16x128xi1>, vector<16x128xf32>
    %45 = arith.select %41, %5, %44 : vector<16x128xi1>, vector<16x128xf32>
    %c0_15 = arith.constant 0 : index
    %c0_16 = arith.constant 0 : index
    %46 = vector.load %arg4[%c0_15, %c0_16] : memref<16x128xf32, #tpu.memory_space<vmem>>, vector<16x128xf32>
    tpu.vector_store %arg4[%c0_15, %c0_16], %45 {strides = array<i32>} : memref<16x128xf32, #tpu.memory_space<vmem>>, vector<16x128xf32>,
    return
  }
  func.func @transform_0(%arg0: i32) -> (i32, i32) {
    %c0_i32 = arith.constant 0 : i32
    %c0_i32_0 = arith.constant 0 : i32
    return %arg0, %c0_i32 : i32, i32
  }
  func.func @transform_1(%arg0: i32) -> (i32, i32) {
    %c0_i32 = arith.constant 0 : i32
    %c0_i32_0 = arith.constant 0 : i32
    %c0_i32_1 = arith.constant 0 : i32
    return %c0_i32, %c0_i32_0 : i32, i32
  }
  func.func @transform_2(%arg0: i32) -> (i32, i32) {
    %c0_i32 = arith.constant 0 : i32
    %c0_i32_0 = arith.constant 0 : i32
    %c0_i32_1 = arith.constant 0 : i32
    return %c0_i32, %c0_i32_0 : i32, i32
  }
  func.func @transform_3(%arg0: i32) -> (i32, i32) {
    %c0_i32 = arith.constant 0 : i32
    %c0_i32_0 = arith.constant 0 : i32
    return %arg0, %c0_i32 : i32, i32
  }
}

</mosaic_0001>

<bundles_post_ra>
// kernel: tpu_custom_call.1
= control target key start
LH: loop header
LB: loop body
LE: loop exit
PB: predicated region body
PF: predicated region fallthrough
CT: control target
= control target key end

     0   :  { %8 = vsyncpa [#allocation3], 0  ;;  %s413_s0 = inlined_call_operand.hbm [shape: f32[16,32], index: 0, kind: input, shape index: {}]   ;;  %s414_s1 = inlined_call_operand.hbm [shape: f32[32,128], index: 1, kind: input, shape index: {}]   ;;  %s415_s2 = inlined_call_operand.vmem [shape: f32[1,128], index: 2, kind: input, shape index: {}]   ;;  %s416_s3 = inlined_call_operand.hbm [shape: f32[16,128], index: 3, kind: output, shape index: {}]  }
   0x1   :  { %9 = vsyncpa [#allocation6], 0 }
   0x2   :  { %10 = vsyncpa [#allocation4], 0  ;;  %s15_s14 = sshll.u32 %s413_s0, 4  ;;  %s324_s15 = smov [#allocation2]   ;;  %s16_s14 = int_to_ptr.hbm [resolvable:$true] %s15_s14 }
   0x3   :  { %s17_s16 = sshll.u32 %s324_s15, 4  ;;  %s28_s19 = sshll.u32 %s414_s1, 4  ;;  %s18_s16 = int_to_ptr.vmem [resolvable:$true] %s17_s16  ;;  %s29_s19 = int_to_ptr.hbm [resolvable:$true] %s28_s19 }
   0x4   :  { %s325_s20 = smov 128   ;;  %s326_s21 = smov 8  }
   0x5   :  { %23 = dma.hbm_to_vmem [thread:$0]  %s16_s14, 256, %s18_s16, [#allocation3], %s325_s20, %s325_s20, %s326_s21  }
   0x6   :  { %s327_s22 = smov [#allocation5]  }
   0x7   :  { %s30_s23 = sshll.u32 %s327_s22, 4  ;;  %s31_s23 = int_to_ptr.vmem [resolvable:$true] %s30_s23 }
   0x8   :  { %36 = dma.hbm_to_vmem [thread:$0]  %s29_s19, 512, %s31_s23, [#allocation6], %s325_s20, %s325_s20, %s326_s21  }
   0x9   :  { %318 = dma.done.wait [#allocation3], 256  }
   0xa   :  { %319 = vsyncadd [#allocation3], 4294967040 }
   0xb   :  { %320 = dma.done.wait [#allocation6], 512  }
   0xc   :  { %321 = vsyncadd [#allocation6], 4294966784  ;;  %v52_v0 = vld [vmem:[#allocation5 + $0x18] sm:$0xff]  ;;  %v51_v1 = vld [vmem:[#allocation5 + $0x10] sm:$0xff]  ;;  %vm57_vm0 = vcmask 261120   ;;  %v87_v6 = vlaneseq  ;;  %s200_s27 = sshll.u32 %s416_s3, 4  ;;  %s201_s27 = int_to_ptr.hbm [resolvable:$true] %s200_s27 }
   0xd   :  { %76 = vmatpush.msra.mxu0 %v52_v0  ;;  %216 = vmatpush.msra.mxu1 %v52_v0  ;;  %v50_v2 = vld [vmem:[#allocation5 + $0x8] sm:$0xff]  ;;  %v49_v3 = vld [vmem:[#allocation5] sm:$0xff]  ;;  %v47_v4 = vld [vmem:[#allocation2] sm:$0xff] }
   0xe   :  { %v48_v5 = vld [vmem:[#allocation2 + $0x8] sm:$0xff]  ;;  %v361_v7 = vand.u32 127, %v87_v6  ;;  %v225_v8 = vld [vmem:[%s415_s2] ss:$0 sm:$0xff]  ;;  %s328_s2 = smov [#allocation7]  }
   0xf   :  { %77 = vmatpush.msra.mxu0 %v51_v1  ;;  %217 = vmatpush.msra.mxu1 %v51_v1  ;;  %s198_s24 = sshll.u32 %s328_s2, 4  ;;  %s199_s24 = int_to_ptr.vmem [resolvable:$true] %s198_s24 }
  0x10   :  { %vm135_vm1 = vcmp.ge.s32.totalorder %v361_v7, 40  ;;  %vm136_vm2 = vcmp.lt.s32.totalorder %v361_v7, 60  ;;  %vm187_vm9 = vcmp.lt.s32.totalorder %v361_v7, 40  ;;  %vm186_vm11 = vcmp.lt.s32.totalorder %v361_v7, 20 }
  0x11   :  { %78 = vmatpush.msra.mxu0 %v50_v2  ;;  %218 = vmatpush.msra.mxu1 %v50_v2  ;;  %vm137_vm3 = vmand %vm135_vm1, %vm136_vm2 }
  0x13   :  { %79 = vmatpush.msra.mxu0 %v49_v3  ;;  %219 = vmatpush.msra.mxu1 %v49_v3 }
  0x14   :  { %214 = vmatmul.msk.f32.vlgmr.msra.gmra.mxu0 %vm57_vm0, %v47_v4  ;;  %215 = vmatmul.msk.f32.vlgmr.msra.gmra.mxu1 %vm57_vm0, %v48_v5 }
  0x91   :  { %v81_v9 = vpop.f32.mrf.mxu0  ;;  %v84_v12 = vpop.f32.mrf.mxu1 }
  0x92   :  { %v368_v10 = vadd.f32 %v225_v8, %v81_v9  ;;  %v371_v13 = vadd.f32 %v225_v8, %v84_v12 }
  0x94   :  { %v138_v11 = vsel %vm137_vm3, %v368_v10, -1e+30  ;;  %v139_v14 = vsel %vm137_vm3, %v371_v13, -1e+30  ;;  %v91_v23 = vand.u32 2147483647, %v368_v10 }
  0x95   :  { %140 = vmax.xlane.f32.xlu0 %v138_v11  ;;  %v92_v25 = vand.u32 2147483647, %v371_v13  ;;  %v89_v35 = vmax.f32 %v368_v10, 0.0  ;;  %v90_v40 = vmax.f32 %v371_v13, 0.0 }
  0x96   :  { %v93_v24 = vsub.f32 0.0, %v91_v23 }
  0x97   :  { %v94_v27 = vsub.f32 0.0, %v92_v25 }
  0x98   :  { %v95_v26 = vmul.f32 1.442695, %v93_v24 }
  0x99   :  { %v97_v28 = vmul.f32 1.442695, %v94_v27 }
  0x9d   :  { %142 = vmax.xlane.f32.xlu0 %v139_v14 }
 0x108   :  { %v141_v15 = vpop.xlane.xlu0 %140 }
 0x109   :  { %v144_v16 = vsub.f32 %v138_v11, %v141_v15 }
 0x10b   :  { %v146_v17 = vmul.f32 1.442695, %v144_v16 }
 0x10d   :  { %226 = vpow2.f32 %v146_v17 }
 0x110   :  { %v143_v18 = vpop.xlane.xlu0 %142 }
 0x111   :  { %v145_v19 = vsub.f32 %v139_v14, %v143_v18 }
 0x113   :  { %v374_v20 = vpop.eup %226  ;;  %v148_v21 = vmul.f32 1.442695, %v145_v19 }
 0x114   :  { %150 = vadd.xlane.f32.xlu1 %v374_v20 }
 0x115   :  { %228 = vpow2.f32 %v148_v21 }
 0x116   :  { %230 = vpow2.f32 %v95_v26 }
 0x117   :  { %232 = vpow2.f32 %v97_v28 }
 0x11b   :  { %v377_v22 = vpop.eup %228 }
 0x11c   :  { %152 = vadd.xlane.f32.xlu1 %v377_v22  ;;  %v231_v29 = vpop.eup %230 }
 0x11d   :  { %v99_v30 = vadd.f32 1.0, %v231_v29  ;;  %v233_v31 = vpop.eup %232 }
 0x11e   :  { %v100_v32 = vadd.f32 1.0, %v233_v31 }
 0x11f   :  { %234 = vlog2.f32 %v99_v30 }
 0x120   :  { %236 = vlog2.f32 %v100_v32 }
 0x125   :  { %v235_v33 = vpop.eup %234 }
 0x126   :  { %v102_v34 = vmul.f32 0.6931472, %v235_v33  ;;  %v237_v36 = vpop.eup %236 }
 0x127   :  { %v104_v38 = vmul.f32 0.6931472, %v237_v36 }
 0x128   :  { %v105_v37 = vadd.f32 %v102_v34, %v89_v35 }
 0x129   :  { %v106_v41 = vadd.f32 %v104_v38, %v90_v40 }
 0x12a   :  { %v107_v39 = vmul.f32 0.1, %v105_v37 }
 0x12b   :  { %v108_v43 = vmul.f32 0.1, %v106_v41 }
 0x12c   :  { %v109_v42 = vadd.f32 0.1, %v107_v39 }
 0x12d   :  { %v384_v44 = vadd.f32 0.1, %v108_v43 }
 0x12e   :  { %238 = vrsqrt.f32 %v109_v42  ;;  %vm118_vm7 = vcmp.eq.f32.partialorder %v109_v42, inf  ;;  %v121_v11 = vand.u32 2147483648, %v109_v42  ;;  %vm120_vm10 = vcmp.eq.f32.partialorder %v109_v42, 0.0 }
 0x12f   :  { %240 = vrsqrt.f32 %v384_v44  ;;  %vm130_vm15 = vcmp.eq.f32.partialorder %v384_v44, inf  ;;  %v133_v28 = vand.u32 2147483648, %v384_v44  ;;  %vm132_vm1 = vcmp.eq.f32.partialorder %v384_v44, 0.0 }
 0x134   :  { %v239_v45 = vpop.eup %238 }
 0x135   :  { %v112_v46 = vmul.f32 %v239_v45, %v109_v42  ;;  %v241_v47 = vpop.eup %240 }
 0x136   :  { %v124_v49 = vmul.f32 %v241_v47, %v384_v44 }
 0x137   :  { %v113_v48 = vmul.f32 %v239_v45, %v112_v46 }
 0x138   :  { %v125_v52 = vmul.f32 %v241_v47, %v124_v49 }
 0x139   :  { %v114_v51 = vmul.f32 0.5, %v113_v48 }
 0x13a   :  { %v126_v55 = vmul.f32 0.5, %v125_v52 }
 0x13b   :  { %v115_v53 = vsub.f32 1.5, %v114_v51 }
 0x13c   :  { %v127_v61 = vsub.f32 1.5, %v126_v55 }
 0x13d   :  { %v116_v58 = vmul.f32 %v239_v45, %v115_v53 }
 0x13e   :  { %v128_v4 = vmul.f32 %v241_v47, %v127_v61 }
 0x13f   :  { %v117_v0 = vmul.f32 %v116_v58, %v109_v42 }
 0x140   :  { %v129_v17 = vmul.f32 %v128_v4, %v384_v44 }
 0x141   :  { %v119_v8 = vsel %vm118_vm7, %v109_v42, %v117_v0 }
 0x142   :  { %v122_v16 = vsel %vm120_vm10, %v121_v11, %v119_v8  ;;  %v131_v26 = vsel %vm130_vm15, %v384_v44, %v129_v17 }
 0x143   :  { %v134_v29 = vsel %vm132_vm1, %v133_v28, %v131_v26 }
 0x187   :  { %v151_v50 = vpop.xlane.xlu1 %150 }
 0x188   :  { %242 = vrcp.f32 %v151_v50  ;;  %v165_v60 = vand.u32 2147483648, %v151_v50  ;;  %v163_v63 = vand.u32 2147483647, %v151_v50  ;;  %vm159_vm5 = vweird.f32 %v151_v50 }
 0x18a   :  { %v166_v3 = vor.u32 1.1754944e-38, %v165_v60  ;;  %vm164_vm8 = vcmp.eq.f32.partialorder %v163_v63, 8.507059e+37 }
 0x18e   :  { %v243_v54 = vpop.eup %242 }
 0x18f   :  { %v155_v56 = vmul.f32 %v243_v54, %v151_v50  ;;  %v153_v57 = vpop.xlane.xlu1 %152  ;;  %vm160_vm4 = vweird.f32 %v243_v54 }
 0x190   :  { %244 = vrcp.f32 %v153_v57  ;;  %vm161_vm6 = vmor %vm159_vm5, %vm160_vm4  ;;  %v180_v15 = vand.u32 2147483648, %v153_v57  ;;  %v178_v19 = vand.u32 2147483647, %v153_v57  ;;  %vm174_vm13 = vweird.f32 %v153_v57 }
 0x191   :  { %v156_v59 = vsub.f32 1.0, %v155_v56 }
 0x192   :  { %vm179_vm0 = vcmp.eq.f32.partialorder %v178_v19, 8.507059e+37 }
 0x193   :  { %v157_v62 = vmul.f32 %v243_v54, %v156_v59 }
 0x195   :  { %v158_v1 = vadd.f32 %v243_v54, %v157_v62 }
 0x196   :  { %v245_v2 = vpop.eup %244 }
 0x197   :  { %v162_v5 = vsel %vm161_vm6, %v243_v54, %v158_v1  ;;  %v170_v6 = vmul.f32 %v245_v2, %v153_v57  ;;  %vm175_vm12 = vweird.f32 %v245_v2 }
 0x198   :  { %v167_v9 = vsel %vm164_vm8, %v166_v3, %v162_v5  ;;  %vm176_vm14 = vmor %vm174_vm13, %vm175_vm12 }
 0x199   :  { %v184_v12 = vmul.f32 %v374_v20, %v167_v9  ;;  %v171_v14 = vsub.f32 1.0, %v170_v6  ;;  %v181_v20 = vor.u32 1.1754944e-38, %v180_v15 }
 0x19b   :  { %v172_v18 = vmul.f32 %v245_v2, %v171_v14  ;;  %v188_v21 = vsel %vm187_vm9, %v122_v16, %v184_v12 }
 0x19c   :  { %v190_v23 = vsel %vm186_vm11, %v368_v10, %v188_v21 }
 0x19d   :  { %v173_v24 = vadd.f32 %v245_v2, %v172_v18  ;;  %192 = vst [vmem:[#allocation7] sm:$0xff] %v190_v23 }
 0x19f   :  { %v177_v25 = vsel %vm176_vm14, %v245_v2, %v173_v24 }
 0x1a0   :  { %v182_v27 = vsel %vm179_vm0, %v181_v20, %v177_v25 }
 0x1a1   :  { %v185_v10 = vmul.f32 %v377_v22, %v182_v27 }
 0x1a3   :  { %v189_v30 = vsel %vm187_vm9, %v134_v29, %v185_v10 }
 0x1a4   :  { %v191_v31 = vsel %vm186_vm11, %v371_v13, %v189_v30 }
 0x1a5   :  { %193 = vst [vmem:[#allocation7 + $0x8] sm:$0xff] %v191_v31 }
 0x1a6   :  { %206 = dma.vmem_to_hbm [thread:$0]  %s199_s24, 256, %s201_s27, [#allocation4], %s325_s20, %s325_s20, %s326_s21  }
 0x1a7   :  { %322 = dma.done.wait [#allocation4], 256  }
 0x1a8   :  { %323 = vsyncadd [#allocation4], 4294967040 }
 0x1a9   :  { %211 = vsyncpa [#allocation3], 1 }
 0x1aa   :  { %212 = vsyncpa [#allocation6], 1 }
 0x1ab   :  { %213 = vsyncpa [#allocation4], 1 }

</bundles_post_ra>
